<compile_context>
chip_gen: v7x
topology: tpu7x:2x2x1
jax: 0.10.0
libtpu: 0.0.40
codegen_flags: <defaults>
</compile_context>

<pallas_src>
import jax
import jax.numpy as jnp
from jax.experimental import pallas as pl
from jax.experimental.pallas import tpu as pltpu


HIDDEN = 256
LANE = 128
SUBLANE = 8


def _round_up(n, m):
    return ((n + m - 1) // m) * m


def actor_critic_kernel(x_ref, w1_ref, b1_ref, w2_ref, b2_ref,
                        wh_ref, bh_ref, out_ref):
    # Three chained MXU matmuls with f32 accumulation + VPU ReLUs on a batch
    # tile resident in VMEM. The fused actor+critic head writes one
    # 128-lane-wide f32 output -> unmasked vst.
    x = x_ref[...].astype(w1_ref.dtype)          # cast to compute dtype (no-op for f32)
    h = jnp.dot(x, w1_ref[...], preferred_element_type=jnp.float32) + b1_ref[...]
    h = jnp.maximum(h, 0.0).astype(w2_ref.dtype)
    h = jnp.dot(h, w2_ref[...], preferred_element_type=jnp.float32) + b2_ref[...]
    h = jnp.maximum(h, 0.0).astype(wh_ref.dtype)
    out_ref[...] = (
        jnp.dot(h, wh_ref[...], preferred_element_type=jnp.float32) + bh_ref[...]
    ).astype(out_ref.dtype)


def prepare_params(params, *, compute_dtype=jnp.float32):
    """One-time weight packing for the Pallas kernel (call once, reuse).

    - Fuses actor + critic into one (256, action_dim+1) matmul, lane-padded
      to 128 so the output store is lane-dense.
    - Casts matmul weights to `compute_dtype`. bf16 is recommended on v5e,
      v6e and v7x alike (bf16-native MXU, half the weight/activation DMA
      bytes); accumulation stays in f32 either way. Biases stay f32 (added
      after the f32 accumulation).
    """
    w1, b1, w2, b2, wa, ba, wc, bc = params
    action_dim = wa.shape[1]
    head = action_dim + 1
    head_pad = _round_up(max(head, LANE), LANE)

    wh = jnp.pad(jnp.concatenate([wa, wc], axis=1),
                 ((0, 0), (0, head_pad - head))).astype(compute_dtype)
    bh = jnp.concatenate([ba.reshape(1, -1), bc.reshape(1, -1)], axis=1)
    bh = jnp.pad(bh, ((0, 0), (0, head_pad - head))).astype(jnp.float32)

    return {
        "w1": w1.astype(compute_dtype),              # (state_dim, 256) -- K unpadded
        "b1": b1.astype(jnp.float32).reshape(1, -1),
        "w2": w2.astype(compute_dtype),
        "b2": b2.astype(jnp.float32).reshape(1, -1),
        "wh": wh,                                    # (256, head_pad) fused head
        "bh": bh,                                    # (1, head_pad)
        "action_dim": action_dim,
        "head_pad": head_pad,
    }


def actor_critic_forward(x, packed, *, batch_tile=256):
    """x: (B, state_dim) float. `packed` from prepare_params().

    Returns (actor_logits (B, action_dim), value (B, 1)), both float32.

    batch_tile: rows per grid step. 256 (up to 512) amortizes the ~0.35 us
    per-step pipeline overhead on v6e/v7x; the tile is rounded to a multiple
    of 8 and, for B >= 256, capped so the grid has >= 2 steps so the
    "parallel" batch axis can be sharded across both v7x TensorCores.
    """
    B, state_dim = x.shape
    action_dim = packed["action_dim"]
    head_pad = packed["head_pad"]

    # ---- tile policy (host-side Python ints only) ---------------------------
    tile = max(SUBLANE, min(int(batch_tile), _round_up(B, SUBLANE)))
    if B >= 2 * LANE:
        tile = min(tile, _round_up(pl.cdiv(B, 2), LANE))  # >= 2 grid steps (v7x)
    tile = _round_up(tile, SUBLANE)                       # (8,128) layout rule
    grid = (pl.cdiv(B, tile),)                            # boundary block masked

    w1, b1, w2, b2, wh, bh = (packed[k] for k in ("w1", "b1", "w2", "b2", "wh", "bh"))

    # Grid-invariant parameter blocks: Pallas skips the re-DMA when the block
    # index is unchanged; the default double-buffer reservation (~0.5 MB of
    # weights) is negligible against the VMEM budget on all generations.
    def rep(i):
        return (0, 0)

    flops = 2 * B * (state_dim * HIDDEN + HIDDEN * HIDDEN + HIDDEN * head_pad)
    bytes_accessed = int(
        x.size * x.dtype.itemsize
        + sum(int(a.size) * a.dtype.itemsize for a in (w1, b1, w2, b2, wh, bh))
        + B * head_pad * 4
    )

    out = pl.pallas_call(
        actor_critic_kernel,
        out_shape=jax.ShapeDtypeStruct((B, head_pad), jnp.float32),
        grid_spec=pl.GridSpec(
            grid=grid,
            in_specs=[
                pl.BlockSpec((tile, state_dim), lambda i: (i, 0)),  # x, unpadded K
                pl.BlockSpec((state_dim, HIDDEN), rep),             # w1
                pl.BlockSpec((1, HIDDEN), rep),                     # b1
                pl.BlockSpec((HIDDEN, HIDDEN), rep),                # w2
                pl.BlockSpec((1, HIDDEN), rep),                     # b2
                pl.BlockSpec((HIDDEN, head_pad), rep),              # fused head W
                pl.BlockSpec((1, head_pad), rep),                   # fused head b
            ],
            out_specs=pl.BlockSpec((tile, head_pad), lambda i: (i, 0)),
        ),
        compiler_params=pltpu.CompilerParams(
            dimension_semantics=("parallel",),
        ),
        cost_estimate=pl.CostEstimate(
            flops=flops, transcendentals=0, bytes_accessed=bytes_accessed),
    )(x, w1, b1, w2, b2, wh, bh)

    actor = out[:, :action_dim]
    critic = out[:, action_dim:action_dim + 1]
    return actor, critic


def init_params(key, state_dim, action_dim):
    """Deterministic synthetic parameters with nn.Linear-like scaling."""
    ks = jax.random.split(key, 8)

    def lin(kw, kb, fan_in, fan_out):
        bound = 1.0 / jnp.sqrt(fan_in)
        w = jax.random.uniform(kw, (fan_in, fan_out), jnp.float32, -bound, bound)
        b = jax.random.uniform(kb, (1, fan_out), jnp.float32, -bound, bound)
        return w, b

    w1, b1 = lin(ks[0], ks[1], state_dim, HIDDEN)
    w2, b2 = lin(ks[2], ks[3], HIDDEN, HIDDEN)
    wa, ba = lin(ks[4], ks[5], HIDDEN, action_dim)
    wc, bc = lin(ks[6], ks[7], HIDDEN, 1)
    return (w1, b1, w2, b2, wa, ba, wc, bc)


def reference_forward(x, params):
    w1, b1, w2, b2, wa, ba, wc, bc = params
    h = jnp.maximum(x @ w1 + b1, 0.0)
    h = jnp.maximum(h @ w2 + b2, 0.0)
    return h @ wa + ba, h @ wc + bc


if __name__ == "__main__":
    key = jax.random.PRNGKey(0)
    k_param, k_x = jax.random.split(key)

    batch, state_dim, action_dim = 8, 16, 4
    params = init_params(k_param, state_dim, action_dim)
    x = jax.random.normal(k_x, (batch, state_dim), dtype=jnp.float32)

    ref_logits, ref_value = reference_forward(x, params)

    # f32 path: exact match against the reference.
    packed_f32 = prepare_params(params, compute_dtype=jnp.float32)
    actor_logits, value = actor_critic_forward(x, packed_f32)
    jax.block_until_ready((actor_logits, value))
    assert actor_logits.shape == (batch, action_dim)
    assert value.shape == (batch, 1)
    assert jnp.allclose(actor_logits, ref_logits, atol=1e-4, rtol=1e-4)
    assert jnp.allclose(value, ref_value, atol=1e-4, rtol=1e-4)

    # bf16 fast path (recommended on v5e/v6e/v7x): f32 accumulation, looser tol.
    packed_bf16 = prepare_params(params, compute_dtype=jnp.bfloat16)
    actor_bf16, value_bf16 = actor_critic_forward(x, packed_bf16)
    jax.block_until_ready((actor_bf16, value_bf16))
    assert jnp.allclose(actor_bf16, ref_logits, atol=5e-2, rtol=5e-2)
    assert jnp.allclose(value_bf16, ref_value, atol=5e-2, rtol=5e-2)

    print("KERNEL_OK")
</pallas_src>

<mosaic_0001>
module attributes {stable_mosaic.version = 11 : i64} {
  func.func @actor_critic_kernel(%arg0: i32, %arg1: memref<8x16xf32, #tpu.memory_space<vmem>>, %arg2: memref<16x256xf32, #tpu.memory_space<vmem>>, %arg3: memref<1x256xf32, #tpu.memory_space<vmem>>, %arg4: memref<256x256xf32, #tpu.memory_space<vmem>>, %arg5: memref<1x256xf32, #tpu.memory_space<vmem>>, %arg6: memref<256x128xf32, #tpu.memory_space<vmem>>, %arg7: memref<1x128xf32, #tpu.memory_space<vmem>>, %arg8: memref<8x128xf32, #tpu.memory_space<vmem>>) attributes {dimension_semantics = [#tpu.dimension_semantics<parallel>], iteration_bounds = array<i64: 1>, scalar_prefetch = 0 : i64, scratch_operands = 0 : i64, tpu.core_type = #tpu.core_type<tc>, window_params = [{transform_indices = @transform_0, window_bounds = array<i64: 8, 16>}, {pipeline_mode = #tpu.pipeline_mode<synchronous>, transform_indices = @transform_1, window_bounds = array<i64: 16, 256>}, {pipeline_mode = #tpu.pipeline_mode<synchronous>, transform_indices = @transform_2, window_bounds = array<i64: 1, 256>}, {pipeline_mode = #tpu.pipeline_mode<synchronous>, transform_indices = @transform_3, window_bounds = array<i64: 256, 256>}, {pipeline_mode = #tpu.pipeline_mode<synchronous>, transform_indices = @transform_4, window_bounds = array<i64: 1, 256>}, {pipeline_mode = #tpu.pipeline_mode<synchronous>, transform_indices = @transform_5, window_bounds = array<i64: 256, 128>}, {pipeline_mode = #tpu.pipeline_mode<synchronous>, transform_indices = @transform_6, window_bounds = array<i64: 1, 128>}, {transform_indices = @transform_7, window_bounds = array<i64: 8, 128>}]} {
    %c0 = arith.constant 0 : index
    %c0_0 = arith.constant 0 : index
    %0 = vector.load %arg1[%c0, %c0_0] : memref<8x16xf32, #tpu.memory_space<vmem>>, vector<8x16xf32>
    %c0_1 = arith.constant 0 : index
    %c0_2 = arith.constant 0 : index
    %1 = vector.load %arg2[%c0_1, %c0_2] : memref<16x256xf32, #tpu.memory_space<vmem>>, vector<16x256xf32>
    %cst = arith.constant dense<0.000000e+00> : vector<8x256xf32>
    %2 = tpu.matmul %0, %1, %cst {dimension_numbers = #tpu.dot_dimension_numbers<[1], [0], [0], [1], [0, 0, 1, 1], [], []>} : vector<8x16xf32>, vector<16x256xf32>, vector<8x256xf32> -> vector<8x256xf32>
    %c0_3 = arith.constant 0 : index
    %c0_4 = arith.constant 0 : index
    %3 = vector.load %arg3[%c0_3, %c0_4] : memref<1x256xf32, #tpu.memory_space<vmem>>, vector<1x256xf32>
    %4 = vector.broadcast %3 : vector<1x256xf32> to vector<8x256xf32>
    %5 = arith.addf %2, %4 : vector<8x256xf32>
    %cst_5 = arith.constant 0.000000e+00 : f32
    %6 = vector.broadcast %cst_5 : f32 to vector<8x256xf32>
    %7 = arith.maximumf %5, %6 : vector<8x256xf32>
    %c0_6 = arith.constant 0 : index
    %c0_7 = arith.constant 0 : index
    %8 = vector.load %arg4[%c0_6, %c0_7] : memref<256x256xf32, #tpu.memory_space<vmem>>, vector<256x256xf32>
    %cst_8 = arith.constant dense<0.000000e+00> : vector<8x256xf32>
    %9 = tpu.matmul %7, %8, %cst_8 {dimension_numbers = #tpu.dot_dimension_numbers<[1], [0], [0], [1], [0, 0, 1, 1], [], []>} : vector<8x256xf32>, vector<256x256xf32>, vector<8x256xf32> -> vector<8x256xf32>
    %c0_9 = arith.constant 0 : index
    %c0_10 = arith.constant 0 : index
    %10 = vector.load %arg5[%c0_9, %c0_10] : memref<1x256xf32, #tpu.memory_space<vmem>>, vector<1x256xf32>
    %11 = vector.broadcast %10 : vector<1x256xf32> to vector<8x256xf32>
    %12 = arith.addf %9, %11 : vector<8x256xf32>
    %cst_11 = arith.constant 0.000000e+00 : f32
    %13 = vector.broadcast %cst_11 : f32 to vector<8x256xf32>
    %14 = arith.maximumf %12, %13 : vector<8x256xf32>
    %c0_12 = arith.constant 0 : index
    %c0_13 = arith.constant 0 : index
    %15 = vector.load %arg6[%c0_12, %c0_13] : memref<256x128xf32, #tpu.memory_space<vmem>>, vector<256x128xf32>
    %cst_14 = arith.constant dense<0.000000e+00> : vector<8x128xf32>
    %16 = tpu.matmul %14, %15, %cst_14 {dimension_numbers = #tpu.dot_dimension_numbers<[1], [0], [0], [1], [0, 0, 1, 1], [], []>} : vector<8x256xf32>, vector<256x128xf32>, vector<8x128xf32> -> vector<8x128xf32>
    %c0_15 = arith.constant 0 : index
    %c0_16 = arith.constant 0 : index
    %17 = vector.load %arg7[%c0_15, %c0_16] : memref<1x128xf32, #tpu.memory_space<vmem>>, vector<1x128xf32>
    %18 = vector.broadcast %17 : vector<1x128xf32> to vector<8x128xf32>
    %19 = arith.addf %16, %18 : vector<8x128xf32>
    %c0_17 = arith.constant 0 : index
    %c0_18 = arith.constant 0 : index
    %20 = vector.load %arg8[%c0_17, %c0_18] : memref<8x128xf32, #tpu.memory_space<vmem>>, vector<8x128xf32>
    tpu.vector_store %arg8[%c0_17, %c0_18], %19 {strides = array<i32>} : memref<8x128xf32, #tpu.memory_space<vmem>>, vector<8x128xf32>,
    return
  }
  func.func @transform_0(%arg0: i32) -> (i32, i32) {
    %c0_i32 = arith.constant 0 : i32
    %c0_i32_0 = arith.constant 0 : i32
    return %arg0, %c0_i32 : i32, i32
  }
  func.func @transform_1(%arg0: i32) -> (i32, i32) {
    %c0_i32 = arith.constant 0 : i32
    %c0_i32_0 = arith.constant 0 : i32
    %c0_i32_1 = arith.constant 0 : i32
    return %c0_i32, %c0_i32_0 : i32, i32
  }
  func.func @transform_2(%arg0: i32) -> (i32, i32) {
    %c0_i32 = arith.constant 0 : i32
    %c0_i32_0 = arith.constant 0 : i32
    %c0_i32_1 = arith.constant 0 : i32
    return %c0_i32, %c0_i32_0 : i32, i32
  }
  func.func @transform_3(%arg0: i32) -> (i32, i32) {
    %c0_i32 = arith.constant 0 : i32
    %c0_i32_0 = arith.constant 0 : i32
    %c0_i32_1 = arith.constant 0 : i32
    return %c0_i32, %c0_i32_0 : i32, i32
  }
  func.func @transform_4(%arg0: i32) -> (i32, i32) {
    %c0_i32 = arith.constant 0 : i32
    %c0_i32_0 = arith.constant 0 : i32
    %c0_i32_1 = arith.constant 0 : i32
    return %c0_i32, %c0_i32_0 : i32, i32
  }
  func.func @transform_5(%arg0: i32) -> (i32, i32) {
    %c0_i32 = arith.constant 0 : i32
    %c0_i32_0 = arith.constant 0 : i32
    %c0_i32_1 = arith.constant 0 : i32
    return %c0_i32, %c0_i32_0 : i32, i32
  }
  func.func @transform_6(%arg0: i32) -> (i32, i32) {
    %c0_i32 = arith.constant 0 : i32
    %c0_i32_0 = arith.constant 0 : i32
    %c0_i32_1 = arith.constant 0 : i32
    return %c0_i32, %c0_i32_0 : i32, i32
  }
  func.func @transform_7(%arg0: i32) -> (i32, i32) {
    %c0_i32 = arith.constant 0 : i32
    %c0_i32_0 = arith.constant 0 : i32
    return %arg0, %c0_i32 : i32, i32
  }
}

</mosaic_0001>

<bundles_post_ra>
// kernel: tpu_custom_call.1
= control target key start
LH: loop header
LB: loop body
LE: loop exit
PB: predicated region body
PF: predicated region fallthrough
CT: control target
= control target key end

     0   :  { %12 = vsyncpa [#allocation3], 0  ;;  %s840_s0 = inlined_call_operand.hbm [shape: f32[8,16], index: 0, kind: input, shape index: {}]   ;;  %s841_s1 = inlined_call_operand.hbm [shape: f32[16,256], index: 1, kind: input, shape index: {}]   ;;  %s842_s2 = inlined_call_operand.vmem [shape: f32[1,256], index: 2, kind: input, shape index: {}]   ;;  %s843_s3 = inlined_call_operand.hbm [shape: f32[256,256], index: 3, kind: input, shape index: {}]   ;;  %s844_s4 = inlined_call_operand.vmem [shape: f32[1,256], index: 4, kind: input, shape index: {}]   ;;  %s845_s5 = inlined_call_operand.hbm [shape: f32[256,128], index: 5, kind: input, shape index: {}]   ;;  %s846_s6 = inlined_call_operand.vmem [shape: f32[1,128], index: 6, kind: input, shape index: {}]   ;;  %s847_s7 = inlined_call_operand.hbm [shape: f32[8,128], index: 7, kind: output, shape index: {}]  }
   0x1   :  { %13 = vsyncpa [#allocation6], 0 }
   0x2   :  { %14 = vsyncpa [#allocation9], 0 }
   0x3   :  { %15 = vsyncpa [#allocation4], 0  ;;  %s715_s24 = smov [#allocation5]   ;;  %s597_s28 = scalar_lea.hbm %s841_s1, 512 }
   0x4   :  { %s31_s25 = sshll.u32 %s715_s24, 4  ;;  %p598_p0 = scmp.ne.s32.totalorder %s841_s1, %s597_s28  ;;  %s32_s25 = int_to_ptr.vmem [resolvable:$true] %s31_s25 }
   0x5   :  { %p601_p1 = scmp.lt.u32.totalorder %s597_s28, %s841_s1 }
   0x7   :  { %p603_p2 = pnand %p601_p1, %p598_p0 }
   0x9   :  { %606 = shalt.err (!%p603_p2)
}
   0xa   :  { %s607_s10 = scalar_lea.vmem %s32_s25, 512  ;;  %p612_p4 = scmp.lt.s32.totalorder %s32_s25, %s32_s25 }
   0xb   :  { %p608_p3 = scmp.ne.s32.totalorder %s32_s25, %s607_s10  ;;  %p613_p5 = scmp.lt.s32.totalorder %s607_s10, %s607_s10 }
   0xd   :  { %p614_p6 = por %p613_p5, %p612_p4 }
   0xf   :  { %p615_p7 = pnand %p614_p6, %p608_p3 }
  0x11   :  { %618 = shalt.err (!%p615_p7)
}
  0x12   :  { %s716_s11 = smov 256   ;;  %s717_s12 = smov 16  }
  0x13   :  { %37 = dma.hbm_to_vmem [thread:$0]  %s841_s1, 512, %s32_s25, [#allocation6], %s716_s11, %s716_s11, %s717_s12  }
  0x14   :  { %s718_s15 = smov [#allocation2]   ;;  %s719_s17 = smov [#allocation7]  }
  0x15   :  { %s22_s16 = sshll.u32 %s718_s15, 4  ;;  %s45_s18 = sshll.u32 %s719_s17, 4  ;;  %s23_s16 = int_to_ptr.vmem [resolvable:$true] %s22_s16  ;;  %s46_s18 = int_to_ptr.vmem [resolvable:$true] %s45_s18 }
  0x16   :  { %s619_s21 = scalar_lea.hbm %s840_s0, 128 }
  0x17   :  { %p620_p8 = scmp.ne.s32.totalorder %s840_s0, %s619_s21  ;;  %p623_p9 = scmp.lt.u32.totalorder %s619_s21, %s840_s0 }
  0x19   :  { %p625_p10 = pnand %p623_p9, %p620_p8 }
  0x1b   :  { %628 = shalt.err (!%p625_p10)
}
  0x1c   :  { %s629_s1 = scalar_lea.vmem %s23_s16, 128  ;;  %p634_p12 = scmp.lt.s32.totalorder %s23_s16, %s23_s16 }
  0x1d   :  { %p630_p11 = scmp.ne.s32.totalorder %s23_s16, %s629_s1  ;;  %p635_p13 = scmp.lt.s32.totalorder %s629_s1, %s629_s1 }
  0x1f   :  { %p636_p0 = por %p635_p13, %p634_p12 }
  0x21   :  { %p637_p1 = pnand %p636_p0, %p630_p11 }
  0x23   :  { %640 = shalt.err (!%p637_p1)
}
  0x24   :  { %25 = dma.hbm_to_vmem [thread:$0]  %s840_s0, 128, %s23_s16, [#allocation3]  }
  0x25   :  { %s641_s30 = scalar_lea.hbm %s843_s3, 8192 }
  0x26   :  { %p642_p2 = scmp.ne.s32.totalorder %s843_s3, %s641_s30  ;;  %p645_p3 = scmp.lt.u32.totalorder %s641_s30, %s843_s3 }
  0x28   :  { %p647_p4 = pnand %p645_p3, %p642_p2 }
  0x2a   :  { %650 = shalt.err (!%p647_p4)
}
  0x2b   :  { %s651_s14 = scalar_lea.vmem %s46_s18, 8192  ;;  %p656_p6 = scmp.lt.s32.totalorder %s46_s18, %s46_s18 }
  0x2c   :  { %p652_p5 = scmp.ne.s32.totalorder %s46_s18, %s651_s14  ;;  %p657_p7 = scmp.lt.s32.totalorder %s651_s14, %s651_s14 }
  0x2e   :  { %p658_p8 = por %p657_p7, %p656_p6 }
  0x30   :  { %p659_p9 = pnand %p658_p8, %p652_p5 }
  0x32   :  { %662 = shalt.err (!%p659_p9)
}
  0x33   :  { %51 = dma.hbm_to_vmem [thread:$0]  %s843_s3, 8192, %s46_s18, [#allocation6], %s716_s11, %s716_s11, %s717_s12  }
  0x34   :  { %s720_s16 = smov [#allocation8]   ;;  %s663_s21 = scalar_lea.hbm %s845_s5, 4096 }
  0x35   :  { %s59_s17 = sshll.u32 %s720_s16, 4  ;;  %p664_p10 = scmp.ne.s32.totalorder %s845_s5, %s663_s21  ;;  %s60_s17 = int_to_ptr.vmem [resolvable:$true] %s59_s17 }
  0x36   :  { %p667_p11 = scmp.lt.u32.totalorder %s663_s21, %s845_s5 }
  0x38   :  { %p669_p12 = pnand %p667_p11, %p664_p10 }
  0x3a   :  { %672 = shalt.err (!%p669_p12)
}
  0x3b   :  { %s673_s1 = scalar_lea.vmem %s60_s17, 4096  ;;  %p678_p0 = scmp.lt.s32.totalorder %s60_s17, %s60_s17 }
  0x3c   :  { %p674_p13 = scmp.ne.s32.totalorder %s60_s17, %s673_s1  ;;  %p679_p1 = scmp.lt.s32.totalorder %s673_s1, %s673_s1 }
  0x3e   :  { %p680_p2 = por %p679_p1, %p678_p0 }
  0x40   :  { %p681_p3 = pnand %p680_p2, %p674_p13 }
  0x42   :  { %684 = shalt.err (!%p681_p3)
}
  0x43   :  { %s721_s3 = smov 128   ;;  %s722_s11 = smov 8  }
  0x44   :  { %65 = dma.hbm_to_vmem [thread:$0]  %s845_s5, 4096, %s60_s17, [#allocation9], %s721_s3, %s721_s3, %s722_s11  }
  0x45   :  { %707 = dma.done.wait [#allocation3], 128  }
  0x46   :  { %708 = vsyncadd [#allocation3], 4294967168 }
  0x47   :  { %709 = dma.done.wait [#allocation6], 8704  }
  0x48   :  { %710 = vsyncadd [#allocation6], 4294958592 }
  0x49   :  { %711 = dma.done.wait [#allocation9], 4096  }
  0x4a   :  { %712 = vsyncadd [#allocation9], 4294963200  ;;  %v723_v0 = vmov 0.0   ;;  %v82_v1 = vld [vmem:[#allocation5 + $0x8] sm:$0xff]  ;;  %v84_v2 = vld [vmem:[#allocation5 + $0x18] sm:$0xff]  ;;  %vm97_vm0 = vcmask 130048  }
  0x4b   :  { %165 = vmatprep.mubr.f32.mxu0 %v723_v0  ;;  %v81_v3 = vld [vmem:[#allocation5] sm:$0xff]  ;;  %v487_v4 = vpack.c.bf16 %v84_v2, %v82_v1  ;;  %v83_v5 = vld [vmem:[#allocation5 + $0x10] sm:$0xff]  ;;  %v175_v6 = vld [vmem:[#allocation7 + $0x8] sm:$0xff]  ;;  %s724_s30 = smov [#allocation10]  }
  0x4c   :  { %v489_v7 = vpack.c.bf16 %v83_v5, %v81_v3  ;;  %v80_v8 = vld [vmem:[#allocation2] sm:$0xff]  ;;  %v174_v10 = vld [vmem:[#allocation7] sm:$0xff]  ;;  %v176_v11 = vld [vmem:[#allocation7 + $0x10] sm:$0xff]  ;;  %s439_s8 = sshll.u32 %s724_s30, 4  ;;  %s440_s8 = int_to_ptr.vmem [resolvable:$true] %s439_s8 }
  0x4d   :  { %v177_v9 = vld [vmem:[#allocation7 + $0x18] sm:$0xff]  ;;  %488 = vmatprep.subr.bf16.mxu0 %v487_v4  ;;  %v493_v13 = vpack.c.bf16 %v176_v11, %v174_v10  ;;  %v179_v14 = vld [vmem:[#allocation7 + $0x28] sm:$0xff]  ;;  %v178_v16 = vld [vmem:[#allocation7 + $0x20] sm:$0xff]  ;;  %p690_p5 = scmp.lt.s32.totalorder %s440_s8, %s440_s8 }
  0x4e   :  { %v491_v12 = vpack.c.bf16 %v177_v9, %v175_v6  ;;  %v181_v15 = vld [vmem:[#allocation7 + $0x38] sm:$0xff]  ;;  %490 = vmatpush1.bf16.msra.mxu0 %v489_v7  ;;  %v180_v18 = vld [vmem:[#allocation7 + $0x30] sm:$0xff]  ;;  %v183_v19 = vld [vmem:[#allocation7 + $0x48] sm:$0xff] }
  0x4f   :  { %v495_v17 = vpack.c.bf16 %v181_v15, %v179_v14  ;;  %v185_v20 = vld [vmem:[#allocation7 + $0x58] sm:$0xff]  ;;  %v497_v21 = vpack.c.bf16 %v180_v18, %v178_v16  ;;  %v182_v23 = vld [vmem:[#allocation7 + $0x40] sm:$0xff]  ;;  %v184_v24 = vld [vmem:[#allocation7 + $0x50] sm:$0xff] }
  0x50   :  { %492 = vmatprep.subr.bf16.mxu1 %v491_v12  ;;  %v499_v22 = vpack.c.bf16 %v185_v20, %v183_v19  ;;  %v187_v25 = vld [vmem:[#allocation7 + $0x68] sm:$0xff]  ;;  %v189_v26 = vld [vmem:[#allocation7 + $0x78] sm:$0xff]  ;;  %v501_v27 = vpack.c.bf16 %v184_v24, %v182_v23  ;;  %v186_v29 = vld [vmem:[#allocation7 + $0x60] sm:$0xff] }
  0x51   :  { %494 = vmatpush1.bf16.msra.mxu1 %v493_v13  ;;  %450 = vmatmul.mubr.msk.f32.vlgmr.msra.gmra.mrb[0].mxu0 %vm97_vm0, %v80_v8  ;;  %v503_v28 = vpack.c.bf16 %v189_v26, %v187_v25  ;;  %v188_v30 = vld [vmem:[#allocation7 + $0x70] sm:$0xff]  ;;  %v191_v31 = vld [vmem:[#allocation7 + $0x88] sm:$0xff]  ;;  %v193_v32 = vld [vmem:[#allocation7 + $0x98] sm:$0xff] }
  0x52   :  { %496 = vmatprep.subr.bf16.mxu1 %v495_v17  ;;  %v505_v33 = vpack.c.bf16 %v188_v30, %v186_v29  ;;  %v507_v34 = vpack.c.bf16 %v193_v32, %v191_v31  ;;  %v190_v35 = vld [vmem:[#allocation7 + $0x80] sm:$0xff]  ;;  %v192_v36 = vld [vmem:[#allocation7 + $0x90] sm:$0xff]  ;;  %v195_v37 = vld [vmem:[#allocation7 + $0xa8] sm:$0xff] }
  0x53   :  { %v197_v38 = vld [vmem:[#allocation7 + $0xb8] sm:$0xff]  ;;  %v509_v39 = vpack.c.bf16 %v192_v36, %v190_v35  ;;  %v194_v41 = vld [vmem:[#allocation7 + $0xa0] sm:$0xff]  ;;  %v196_v42 = vld [vmem:[#allocation7 + $0xb0] sm:$0xff] }
  0x54   :  { %v511_v40 = vpack.c.bf16 %v197_v38, %v195_v37  ;;  %v199_v43 = vld [vmem:[#allocation7 + $0xc8] sm:$0xff]  ;;  %v201_v44 = vld [vmem:[#allocation7 + $0xd8] sm:$0xff]  ;;  %v513_v45 = vpack.c.bf16 %v196_v42, %v194_v41  ;;  %v198_v47 = vld [vmem:[#allocation7 + $0xc0] sm:$0xff] }
  0x55   :  { %498 = vmatpush1.bf16.msra.mxu1 %v497_v21  ;;  %v515_v46 = vpack.c.bf16 %v201_v44, %v199_v43  ;;  %v200_v48 = vld [vmem:[#allocation7 + $0xd0] sm:$0xff]  ;;  %v203_v49 = vld [vmem:[#allocation7 + $0xe8] sm:$0xff]  ;;  %v205_v50 = vld [vmem:[#allocation7 + $0xf8] sm:$0xff] }
  0x56   :  { %500 = vmatprep.subr.bf16.mxu1 %v499_v22  ;;  %v517_v51 = vpack.c.bf16 %v200_v48, %v198_v47  ;;  %v519_v52 = vpack.c.bf16 %v205_v50, %v203_v49  ;;  %v202_v53 = vld [vmem:[#allocation7 + $0xe0] sm:$0xff]  ;;  %v204_v54 = vld [vmem:[#allocation7 + $0xf0] sm:$0xff]  ;;  %v207_v55 = vld [vmem:[#allocation7 + $0x108] sm:$0xff] }
  0x57   :  { %v209_v56 = vld [vmem:[#allocation7 + $0x118] sm:$0xff]  ;;  %v521_v57 = vpack.c.bf16 %v204_v54, %v202_v53  ;;  %v206_v59 = vld [vmem:[#allocation7 + $0x100] sm:$0xff]  ;;  %v208_v60 = vld [vmem:[#allocation7 + $0x110] sm:$0xff] }
  0x58   :  { %v523_v58 = vpack.c.bf16 %v209_v56, %v207_v55  ;;  %v211_v61 = vld [vmem:[#allocation7 + $0x128] sm:$0xff]  ;;  %v213_v62 = vld [vmem:[#allocation7 + $0x138] sm:$0xff]  ;;  %v525_v63 = vpack.c.bf16 %v208_v60, %v206_v59  ;;  %v210_v1 = vld [vmem:[#allocation7 + $0x120] sm:$0xff] }
  0x59   :  { %502 = vmatpush1.bf16.msra.mxu1 %v501_v27  ;;  %v527_v0 = vpack.c.bf16 %v213_v62, %v211_v61  ;;  %v212_v2 = vld [vmem:[#allocation7 + $0x130] sm:$0xff]  ;;  %v215_v3 = vld [vmem:[#allocation7 + $0x148] sm:$0xff]  ;;  %v217_v4 = vld [vmem:[#allocation7 + $0x158] sm:$0xff] }
  0x5a   :  { %504 = vmatprep.subr.bf16.mxu1 %v503_v28  ;;  %v529_v5 = vpack.c.bf16 %v212_v2, %v210_v1  ;;  %v531_v6 = vpack.c.bf16 %v217_v4, %v215_v3  ;;  %v214_v7 = vld [vmem:[#allocation7 + $0x140] sm:$0xff]  ;;  %v216_v8 = vld [vmem:[#allocation7 + $0x150] sm:$0xff]  ;;  %v219_v9 = vld [vmem:[#allocation7 + $0x168] sm:$0xff] }
  0x5b   :  { %v221_v10 = vld [vmem:[#allocation7 + $0x178] sm:$0xff]  ;;  %v533_v11 = vpack.c.bf16 %v216_v8, %v214_v7  ;;  %v218_v13 = vld [vmem:[#allocation7 + $0x160] sm:$0xff]  ;;  %v220_v14 = vld [vmem:[#allocation7 + $0x170] sm:$0xff] }
  0x5c   :  { %v535_v12 = vpack.c.bf16 %v221_v10, %v219_v9  ;;  %v223_v15 = vld [vmem:[#allocation7 + $0x188] sm:$0xff]  ;;  %v225_v16 = vld [vmem:[#allocation7 + $0x198] sm:$0xff]  ;;  %v537_v17 = vpack.c.bf16 %v220_v14, %v218_v13  ;;  %v222_v19 = vld [vmem:[#allocation7 + $0x180] sm:$0xff] }
  0x5d   :  { %506 = vmatpush1.bf16.msra.mxu1 %v505_v33  ;;  %v539_v18 = vpack.c.bf16 %v225_v16, %v223_v15  ;;  %v224_v20 = vld [vmem:[#allocation7 + $0x190] sm:$0xff]  ;;  %v227_v21 = vld [vmem:[#allocation7 + $0x1a8] sm:$0xff]  ;;  %v229_v22 = vld [vmem:[#allocation7 + $0x1b8] sm:$0xff]  ;;  %v87_v15 = vlaneseq }
  0x5e   :  { %508 = vmatprep.subr.bf16.mxu1 %v507_v34  ;;  %v541_v23 = vpack.c.bf16 %v224_v20, %v222_v19  ;;  %v543_v24 = vpack.c.bf16 %v229_v22, %v227_v21  ;;  %v226_v25 = vld [vmem:[#allocation7 + $0x1a0] sm:$0xff]  ;;  %v228_v26 = vld [vmem:[#allocation7 + $0x1b0] sm:$0xff]  ;;  %v231_v27 = vld [vmem:[#allocation7 + $0x1c8] sm:$0xff] }
  0x5f   :  { %v233_v28 = vld [vmem:[#allocation7 + $0x1d8] sm:$0xff]  ;;  %v545_v29 = vpack.c.bf16 %v228_v26, %v226_v25  ;;  %v230_v31 = vld [vmem:[#allocation7 + $0x1c0] sm:$0xff]  ;;  %v232_v32 = vld [vmem:[#allocation7 + $0x1d0] sm:$0xff]  ;;  %v88_v16 = vshrl.u32 %v87_v15, 7 }
  0x60   :  { %v547_v30 = vpack.c.bf16 %v233_v28, %v231_v27  ;;  %v549_v33 = vpack.c.bf16 %v232_v32, %v230_v31  ;;  %v235_v34 = vld [vmem:[#allocation7 + $0x1e8] sm:$0xff]  ;;  %v237_v35 = vld [vmem:[#allocation7 + $0x1f8] sm:$0xff]  ;;  %v234_v37 = vld [vmem:[#allocation7 + $0x1e0] sm:$0xff] }
  0x61   :  { %510 = vmatpush1.bf16.msra.mxu1 %v509_v39  ;;  %v551_v36 = vpack.c.bf16 %v237_v35, %v235_v34  ;;  %v236_v38 = vld [vmem:[#allocation7 + $0x1f0] sm:$0xff]  ;;  %v340_v41 = vld [vmem:[#allocation8 + $0x88] sm:$0xff]  ;;  %v323_v42 = vld [vmem:[#allocation8] sm:$0xff]  ;;  %v93_v19 = vsub.s32 1, %v88_v16 }
  0x62   :  { %512 = vmatprep.subr.bf16.mxu1 %v511_v40  ;;  %v553_v39 = vpack.c.bf16 %v236_v38, %v234_v37  ;;  %v339_v40 = vld [vmem:[#allocation8 + $0x80] sm:$0xff]  ;;  %v324_v44 = vld [vmem:[#allocation8 + $0x8] sm:$0xff]  ;;  %v325_v49 = vld [vmem:[#allocation8 + $0x10] sm:$0xff] }
  0x63   :  { %v555_v43 = vpack.c.bf16 %v340_v41, %v339_v40  ;;  %v557_v47 = vpack.c.bf16 %v324_v44, %v323_v42  ;;  %v326_v50 = vld [vmem:[#allocation8 + $0x18] sm:$0xff]  ;;  %v327_v55 = vld [vmem:[#allocation8 + $0x20] sm:$0xff]  ;;  %v328_v56 = vld [vmem:[#allocation8 + $0x28] sm:$0xff] }
  0x64   :  { %v561_v53 = vpack.c.bf16 %v326_v50, %v325_v49  ;;  %v565_v59 = vpack.c.bf16 %v328_v56, %v327_v55  ;;  %v329_v61 = vld [vmem:[#allocation8 + $0x30] sm:$0xff]  ;;  %v330_v62 = vld [vmem:[#allocation8 + $0x38] sm:$0xff]  ;;  %v331_v3 = vld [vmem:[#allocation8 + $0x40] sm:$0xff] }
  0x65   :  { %514 = vmatpush1.bf16.msra.mxu1 %v513_v45  ;;  %v341_v45 = vld [vmem:[#allocation8 + $0x90] sm:$0xff]  ;;  %556 = vmatprep.subr.bf16.mxu0 %v555_v43  ;;  %v569_v1 = vpack.c.bf16 %v330_v62, %v329_v61  ;;  %v332_v4 = vld [vmem:[#allocation8 + $0x48] sm:$0xff]  ;;  %v334_v10 = vld [vmem:[#allocation8 + $0x58] sm:$0xff] }
  0x66   :  { %516 = vmatprep.subr.bf16.mxu1 %v515_v46  ;;  %v342_v46 = vld [vmem:[#allocation8 + $0x98] sm:$0xff]  ;;  %558 = vmatpush3.bf16.msra.mxu0 %v557_v47  ;;  %v573_v7 = vpack.c.bf16 %v332_v4, %v331_v3  ;;  %v333_v9 = vld [vmem:[#allocation8 + $0x50] sm:$0xff]  ;;  %v335_v28 = vld [vmem:[#allocation8 + $0x60] sm:$0xff] }
  0x67   :  { %v559_v48 = vpack.c.bf16 %v342_v46, %v341_v45  ;;  %v577_v13 = vpack.c.bf16 %v334_v10, %v333_v9  ;;  %v353_v31 = vld [vmem:[#allocation8 + $0xf0] sm:$0xff]  ;;  %v354_v32 = vld [vmem:[#allocation8 + $0xf8] sm:$0xff] }
  0x68   :  { %v337_v34 = vld [vmem:[#allocation8 + $0x70] sm:$0xff]  ;;  %v338_v35 = vld [vmem:[#allocation8 + $0x78] sm:$0xff] }
  0x69   :  { %518 = vmatpush1.bf16.msra.mxu1 %v517_v51  ;;  %v343_v51 = vld [vmem:[#allocation8 + $0xa0] sm:$0xff]  ;;  %560 = vmatprep.subr.bf16.mxu0 %v559_v48  ;;  %v238_v37 = vld [vmem:[%s844_s4] sm:$0x3]  ;;  %s685_s4 = scalar_lea.vmem %s440_s8, 128 }
  0x6a   :  { %520 = vmatprep.subr.bf16.mxu1 %v519_v52  ;;  %v344_v52 = vld [vmem:[#allocation8 + $0xa8] sm:$0xff]  ;;  %562 = vmatpush3.bf16.msra.mxu0 %v561_v53  ;;  %v451_v47 = vld [vmem:[%s846_s6] ss:$0 sm:$0xff]  ;;  %p686_p4 = scmp.ne.s32.totalorder %s440_s8, %s685_s4  ;;  %p691_p6 = scmp.lt.s32.totalorder %s685_s4, %s685_s4 }
  0x6b   :  { %v563_v54 = vpack.c.bf16 %v344_v52, %v343_v51 }
  0x6c   :  { %p692_p7 = por %p691_p6, %p690_p5 }
  0x6d   :  { %522 = vmatpush1.bf16.msra.mxu1 %v521_v57  ;;  %v345_v57 = vld [vmem:[#allocation8 + $0xb0] sm:$0xff]  ;;  %564 = vmatprep.subr.bf16.mxu0 %v563_v54 }
  0x6e   :  { %524 = vmatprep.subr.bf16.mxu1 %v523_v58  ;;  %v346_v58 = vld [vmem:[#allocation8 + $0xb8] sm:$0xff]  ;;  %566 = vmatpush3.bf16.msra.mxu0 %v565_v59  ;;  %p693_p8 = pnand %p692_p7, %p686_p4 }
  0x6f   :  { %v567_v60 = vpack.c.bf16 %v346_v58, %v345_v57 }
  0x71   :  { %526 = vmatpush1.bf16.msra.mxu1 %v525_v63  ;;  %v347_v63 = vld [vmem:[#allocation8 + $0xc0] sm:$0xff]  ;;  %568 = vmatprep.subr.bf16.mxu0 %v567_v60 }
  0x72   :  { %528 = vmatprep.subr.bf16.mxu1 %v527_v0  ;;  %v348_v0 = vld [vmem:[#allocation8 + $0xc8] sm:$0xff]  ;;  %570 = vmatpush3.bf16.msra.mxu0 %v569_v1 }
  0x73   :  { %v571_v2 = vpack.c.bf16 %v348_v0, %v347_v63 }
  0x75   :  { %530 = vmatpush1.bf16.msra.mxu1 %v529_v5  ;;  %v349_v5 = vld [vmem:[#allocation8 + $0xd0] sm:$0xff]  ;;  %572 = vmatprep.subr.bf16.mxu0 %v571_v2 }
  0x76   :  { %532 = vmatprep.subr.bf16.mxu1 %v531_v6  ;;  %v350_v6 = vld [vmem:[#allocation8 + $0xd8] sm:$0xff]  ;;  %574 = vmatpush3.bf16.msra.mxu0 %v573_v7 }
  0x77   :  { %v575_v8 = vpack.c.bf16 %v350_v6, %v349_v5 }
  0x79   :  { %534 = vmatpush1.bf16.msra.mxu1 %v533_v11  ;;  %v351_v11 = vld [vmem:[#allocation8 + $0xe0] sm:$0xff]  ;;  %576 = vmatprep.subr.bf16.mxu0 %v575_v8 }
  0x7a   :  { %536 = vmatprep.subr.bf16.mxu1 %v535_v12  ;;  %v352_v12 = vld [vmem:[#allocation8 + $0xe8] sm:$0xff]  ;;  %578 = vmatpush3.bf16.msra.mxu0 %v577_v13 }
  0x7b   :  { %v579_v14 = vpack.c.bf16 %v352_v12, %v351_v11 }
  0x7d   :  { %538 = vmatpush1.bf16.msra.mxu1 %v537_v17  ;;  %580 = vmatprep.subr.bf16.mxu0 %v579_v14  ;;  %v89_v17 = vsub.s32 0, %v88_v16 }
  0x7e   :  { %540 = vmatprep.subr.bf16.mxu1 %v539_v18  ;;  %v85_v18 = vld [vmem:[%s842_s2] sm:$0x3] }
  0x7f   :  { %v90_v20 = vrot.slane %v85_v18, %v89_v17  ;;  %v94_v21 = vrot.slane %v85_v18, %v93_v19  ;;  %v243_v38 = vrot.slane %v238_v37, %v89_v17 }
  0x81   :  { %542 = vmatpush1.bf16.msra.mxu1 %v541_v23 }
  0x82   :  { %544 = vmatprep.subr.bf16.mxu1 %v543_v24 }
  0x85   :  { %546 = vmatpush1.bf16.msra.mxu1 %v545_v29  ;;  %v336_v29 = vld [vmem:[#allocation8 + $0x68] sm:$0xff] }
  0x86   :  { %548 = vmatprep.subr.bf16.mxu1 %v547_v30  ;;  %v581_v30 = vpack.c.bf16 %v336_v29, %v335_v28 }
  0x88   :  { %582 = vmatpush3.bf16.msra.mxu0 %v581_v30 }
  0x89   :  { %550 = vmatpush1.bf16.msra.mxu1 %v549_v33  ;;  %v583_v33 = vpack.c.bf16 %v354_v32, %v353_v31 }
  0x8a   :  { %552 = vmatprep.subr.bf16.mxu1 %v551_v36  ;;  %v585_v36 = vpack.c.bf16 %v338_v35, %v337_v34 }
  0x8b   :  { %584 = vmatprep.subr.bf16.mxu0 %v583_v33 }
  0x8c   :  { %586 = vmatpush3.bf16.msra.mxu0 %v585_v36 }
  0x8d   :  { %554 = vmatpush1.bf16.msra.mxu1 %v553_v39  ;;  %v247_v39 = vrot.slane %v238_v37, %v93_v19 }
 0x124   :  { %v167_v22 = vpop.f32.mrb[0].mxu0 }
 0x125   :  { %v168_v23 = vadd.f32 %v167_v22, %v90_v20  ;;  %v169_v24 = vpop.f32.mrb[1].mxu0 }
 0x126   :  { %v170_v25 = vadd.f32 %v169_v24, %v94_v21 }
 0x127   :  { %v172_v27 = vmax.f32 %v168_v23, 0.0 }
 0x128   :  { %v173_v26 = vmax.f32 %v170_v25, 0.0 }
 0x12a   :  { %314 = vmatprep.mubr.f32.mxu1 %v173_v26 }
 0x12b   :  { %315 = vmatmul.mubr.f32.vlgmr.msra.gmra.mrb[0].mxu1 %v172_v27 }
 0x1fe   :  { %v316_v40 = vpop.f32.mrb[0].mxu1 }
 0x1ff   :  { %v317_v41 = vadd.f32 %v316_v40, %v243_v38  ;;  %v318_v42 = vpop.f32.mrb[1].mxu1 }
 0x200   :  { %v319_v43 = vadd.f32 %v318_v42, %v247_v39 }
 0x201   :  { %v321_v45 = vmax.f32 %v317_v41, 0.0 }
 0x202   :  { %v322_v44 = vmax.f32 %v319_v43, 0.0 }
 0x204   :  { %426 = vmatprep.mubr.f32.mxu0 %v322_v44 }
 0x205   :  { %427 = vmatmul.mubr.f32.vlgmr.msra.gmra.mrb[2].mxu0 %v321_v45 }
 0x2d8   :  { %v484_v46 = vpop.f32.mrb[2].mxu0 }
 0x2d9   :  { %v485_v48 = vpop.f32.mrb[3].mxu0 }
 0x2da   :  { %v486_v49 = vadd.f32 %v485_v48, %v484_v46 }
 0x2dc   :  { %v429_v50 = vadd.f32 %v486_v49, %v451_v47 }
 0x2de   :  { %432 = vst [vmem:[#allocation10] sm:$0xff] %v429_v50 }
 0x2df   :  { %696 = shalt.err (!%p693_p8)
}
 0x2e0   :  { %s697_s13 = scalar_lea.hbm %s847_s7, 128 }
 0x2e1   :  { %p698_p9 = scmp.ne.s32.totalorder %s847_s7, %s697_s13  ;;  %p701_p10 = scmp.lt.u32.totalorder %s697_s13, %s847_s7 }
 0x2e3   :  { %p703_p11 = pnand %p701_p10, %p698_p9 }
 0x2e5   :  { %706 = shalt.err (!%p703_p11)
}
 0x2e6   :  { %442 = dma.vmem_to_hbm [thread:$0]  %s440_s8, 128, %s847_s7, [#allocation4]  }
 0x2e7   :  { %713 = dma.done.wait [#allocation4], 128  }
 0x2e8   :  { %714 = vsyncadd [#allocation4], 4294967168 }
 0x2e9   :  { %446 = vsyncpa [#allocation3], 1 }
 0x2ea   :  { %447 = vsyncpa [#allocation6], 1 }
 0x2eb   :  { %448 = vsyncpa [#allocation9], 1 }
 0x2ec   :  { %449 = vsyncpa [#allocation4], 1 }

</bundles_post_ra>
